<compile_context>
chip_gen: v5e
topology: v5e:2x2
jax: 0.10.0
libtpu: 0.0.40
codegen_flags: <defaults>
</compile_context>

<pallas_src>
import functools

import jax
import jax.numpy as jnp
from jax.experimental import pallas as pl
from jax.experimental.pallas import tpu as pltpu


def attackers_kernel(x_ref, w1_ref, b1_ref, w2_ref, b2_ref, y_ref,
                     loss_ref, pred_ref, *, n_attack, n_classes):
    """Single-step kernel: all attacker heads, argmax and CE loss fused."""
    B = x_ref.shape[0]
    N = n_attack
    C = n_classes

    # ---- fused first layer: one wide MXU matmul over all attackers ----------
    x = x_ref[...]                                             # (B, D)
    h_all = jnp.maximum(
        jnp.dot(x, w1_ref[...], preferred_element_type=jnp.float32)
        + b1_ref[...],
        0.0)                                                   # (B, N*H)

    # ---- fused second layer: block-diagonal W2 on the MXU --------------------
    # Column layout is class-major: column c*N + i holds logit of class c for
    # attacker i, so logits[:, c*N:(c+1)*N] is a contiguous (B, N) slice.
    logits = (jnp.dot(h_all, w2_ref[...], preferred_element_type=jnp.float32)
              + b2_ref[...])                                   # (B, C*N)

    labels = y_ref[...]                                        # (B, N) int32
    cols = [logits[:, c * N:(c + 1) * N] for c in range(C)]    # C x (B, N)

    # ---- argmax with first-max tie-break (matches torch / jnp) --------------
    best = cols[0]
    pred = jnp.zeros((B, N), jnp.int32)
    for c in range(1, C):                                      # static, C is tiny
        is_better = cols[c] > best
        pred = jnp.where(is_better, jnp.int32(c), pred)
        best = jnp.maximum(best, cols[c])
    pred_ref[...] = pred                                       # one dense store

    # ---- stable cross-entropy, vectorized across attackers ------------------
    sum_exp = jnp.zeros((B, N), jnp.float32)
    logit_y = jnp.zeros((B, N), jnp.float32)
    for c in range(C):                                         # static, C is tiny
        sum_exp = sum_exp + jnp.exp(cols[c] - best)
        logit_y = logit_y + jnp.where(labels == c, cols[c], 0.0)
    per_ex = (best + jnp.log(sum_exp)) - logit_y               # (B, N)

    # sum_i mean_b CE  ==  (1/B) * sum_{b,i} per_ex  -> scalar through SMEM
    loss_ref[0, 0] = jnp.sum(per_ex) * (1.0 / B)


@jax.jit
def attackers_forward(x, w1, b1, w2, b2, labels):
    """x:(B,D)  w1:(N,D,H)  b1:(N,H)  w2:(N,H,C)  b2:(N,C)  labels:(N,B) int32."""
    n_attack, D, H = w1.shape
    C = w2.shape[-1]
    B = x.shape[0]

    # Repack weights (once, outside the kernel):
    #   * first layer concatenated along the output axis      -> (D, N*H)
    #   * second layer block-diagonal, class-major columns    -> (N*H, C*N)
    w1_cat = jnp.transpose(w1, (1, 0, 2)).reshape(D, n_attack * H)    # (D, N*H)
    b1_cat = b1.reshape(1, n_attack * H)                              # (1, N*H)
    eye = jnp.eye(n_attack, dtype=w2.dtype)                           # (N, N)
    # out[n*H + h, c*N + m] = w2[n, h, c] * (n == m)
    w2_bd = jnp.einsum('nhc,nm->nhcm', w2, eye).reshape(
        n_attack * H, C * n_attack)                                   # (N*H, C*N)
    b2_cn = b2.T.reshape(1, C * n_attack)                             # (1, C*N)
    labels_bn = labels.T.astype(jnp.int32)                            # (B, N)

    kernel = functools.partial(attackers_kernel,
                               n_attack=n_attack, n_classes=C)

    cost = pl.CostEstimate(
        flops=2 * B * D * n_attack * H
              + 2 * B * (n_attack * H) * (C * n_attack),
        transcendentals=B * n_attack * (C + 1),
        bytes_accessed=4 * (x.size + w1_cat.size + b1_cat.size + w2_bd.size
                            + b2_cn.size + labels_bn.size
                            + B * n_attack + 1),
    )

    loss, preds_bn = pl.pallas_call(
        kernel,
        out_shape=(jax.ShapeDtypeStruct((1, 1), jnp.float32),
                   jax.ShapeDtypeStruct((B, n_attack), jnp.int32)),
        grid_spec=pltpu.PrefetchScalarGridSpec(
            num_scalar_prefetch=0,
            grid=(1,),
            in_specs=[
                pl.BlockSpec((B, D), lambda i: (0, 0)),                 # x
                pl.BlockSpec((D, n_attack * H), lambda i: (0, 0)),      # W1 fused
                pl.BlockSpec((1, n_attack * H), lambda i: (0, 0)),      # b1 fused
                pl.BlockSpec((n_attack * H, C * n_attack),
                             lambda i: (0, 0)),                         # W2 blockdiag
                pl.BlockSpec((1, C * n_attack), lambda i: (0, 0)),      # b2
                pl.BlockSpec((B, n_attack), lambda i: (0, 0)),          # labels
            ],
            out_specs=[
                pl.BlockSpec(memory_space=pltpu.MemorySpace.SMEM),      # scalar loss
                pl.BlockSpec((B, n_attack), lambda i: (0, 0)),          # preds
            ],
        ),
        compiler_params=pltpu.CompilerParams(
            dimension_semantics=("arbitrary",)),
        cost_estimate=cost,
    )(x, w1_cat, b1_cat, w2_bd, b2_cn, labels_bn)

    total_loss = loss[0, 0]
    preds = preds_bn.T                      # (n_attack, B), stacked (no list)
    return total_loss, preds


def reference_forward(x, w1, b1, w2, b2, labels):
    """Pure-JAX reference mirroring the torch module."""
    h = jax.nn.relu(jnp.einsum('bd,ndh->nbh', x, w1) + b1[:, None, :])
    logits = jnp.einsum('nbh,nhc->nbc', h, w2) + b2[:, None, :]
    preds = jnp.argmax(logits, axis=-1)
    logz = jax.nn.logsumexp(logits, axis=-1)
    logit_y = jnp.take_along_axis(logits, labels[..., None], axis=-1)[..., 0]
    loss = jnp.sum(jnp.mean(logz - logit_y, axis=-1))
    return loss, preds


if __name__ == "__main__":
    B, D, H, C, N_ATTACK = 8, 32, 64, 2, 3   # batch, repr_dim, hiddens, n_classes, n_attack

    key = jax.random.PRNGKey(0)
    kx, kw1, kb1, kw2, kb2, ky = jax.random.split(key, 6)

    x = jax.random.normal(kx, (B, D), jnp.float32)

    # nn.Linear-style uniform init: U(-1/sqrt(fan_in), 1/sqrt(fan_in))
    bnd1 = 1.0 / (D ** 0.5)
    w1 = jax.random.uniform(kw1, (N_ATTACK, D, H), jnp.float32, -bnd1, bnd1)
    b1 = jax.random.uniform(kb1, (N_ATTACK, H), jnp.float32, -bnd1, bnd1)
    bnd2 = 1.0 / (H ** 0.5)
    w2 = jax.random.uniform(kw2, (N_ATTACK, H, C), jnp.float32, -bnd2, bnd2)
    b2 = jax.random.uniform(kb2, (N_ATTACK, C), jnp.float32, -bnd2, bnd2)

    # `outputs` in the torch forward: one label vector per attacker.
    labels = jax.random.randint(ky, (N_ATTACK, B), 0, C, jnp.int32)

    loss, preds = attackers_forward(x, w1, b1, w2, b2, labels)
    jax.block_until_ready((loss, preds))

    ref_loss, ref_preds = reference_forward(x, w1, b1, w2, b2, labels)
    assert jnp.allclose(loss, ref_loss, atol=1e-4, rtol=1e-4), (loss, ref_loss)
    assert jnp.array_equal(preds, ref_preds), (preds, ref_preds)

    print("KERNEL_OK")
</pallas_src>

<mosaic_0001>
module attributes {stable_mosaic.version = 11 : i64} {
  func.func @attackers_kernel(%arg0: i32, %arg1: memref<8x32xf32, #tpu.memory_space<vmem>>, %arg2: memref<32x192xf32, #tpu.memory_space<vmem>>, %arg3: memref<1x192xf32, #tpu.memory_space<vmem>>, %arg4: memref<192x6xf32, #tpu.memory_space<vmem>>, %arg5: memref<1x6xf32, #tpu.memory_space<vmem>>, %arg6: memref<8x3xi32, #tpu.memory_space<vmem>>, %arg7: memref<1x1xf32, #tpu.memory_space<smem>>, %arg8: memref<8x3xi32, #tpu.memory_space<vmem>>) attributes {dimension_semantics = [#tpu.dimension_semantics<arbitrary>], iteration_bounds = array<i64: 1>, scalar_prefetch = 0 : i64, scratch_operands = 0 : i64, tpu.core_type = #tpu.core_type<tc>, window_params = [{pipeline_mode = #tpu.pipeline_mode<synchronous>, transform_indices = @transform_0, window_bounds = array<i64: 8, 32>}, {pipeline_mode = #tpu.pipeline_mode<synchronous>, transform_indices = @transform_1, window_bounds = array<i64: 32, 192>}, {pipeline_mode = #tpu.pipeline_mode<synchronous>, transform_indices = @transform_2, window_bounds = array<i64: 1, 192>}, {pipeline_mode = #tpu.pipeline_mode<synchronous>, transform_indices = @transform_3, window_bounds = array<i64: 192, 6>}, {pipeline_mode = #tpu.pipeline_mode<synchronous>, transform_indices = @transform_4, window_bounds = array<i64: 1, 6>}, {pipeline_mode = #tpu.pipeline_mode<synchronous>, transform_indices = @transform_5, window_bounds = array<i64: 8, 3>}, {transform_indices = @transform_6, window_bounds = array<i64: 1, 1>}, {pipeline_mode = #tpu.pipeline_mode<synchronous>, transform_indices = @transform_7, window_bounds = array<i64: 8, 3>}]} {
    %c0 = arith.constant 0 : index
    %c0_0 = arith.constant 0 : index
    %0 = vector.load %arg1[%c0, %c0_0] : memref<8x32xf32, #tpu.memory_space<vmem>>, vector<8x32xf32>
    %c0_1 = arith.constant 0 : index
    %c0_2 = arith.constant 0 : index
    %1 = vector.load %arg2[%c0_1, %c0_2] : memref<32x192xf32, #tpu.memory_space<vmem>>, vector<32x192xf32>
    %cst = arith.constant dense<0.000000e+00> : vector<8x192xf32>
    %2 = tpu.matmul %0, %1, %cst {dimension_numbers = #tpu.dot_dimension_numbers<[1], [0], [0], [1], [0, 0, 1, 1], [], []>} : vector<8x32xf32>, vector<32x192xf32>, vector<8x192xf32> -> vector<8x192xf32>
    %c0_3 = arith.constant 0 : index
    %c0_4 = arith.constant 0 : index
    %3 = vector.load %arg3[%c0_3, %c0_4] : memref<1x192xf32, #tpu.memory_space<vmem>>, vector<1x192xf32>
    %4 = vector.broadcast %3 : vector<1x192xf32> to vector<8x192xf32>
    %5 = arith.addf %2, %4 : vector<8x192xf32>
    %cst_5 = arith.constant 0.000000e+00 : f32
    %6 = vector.broadcast %cst_5 : f32 to vector<8x192xf32>
    %7 = arith.maximumf %5, %6 : vector<8x192xf32>
    %c0_6 = arith.constant 0 : index
    %c0_7 = arith.constant 0 : index
    %8 = vector.load %arg4[%c0_6, %c0_7] : memref<192x6xf32, #tpu.memory_space<vmem>>, vector<192x6xf32>
    %cst_8 = arith.constant dense<0.000000e+00> : vector<8x6xf32>
    %9 = tpu.matmul %7, %8, %cst_8 {dimension_numbers = #tpu.dot_dimension_numbers<[1], [0], [0], [1], [0, 0, 1, 1], [], []>} : vector<8x192xf32>, vector<192x6xf32>, vector<8x6xf32> -> vector<8x6xf32>
    %c0_9 = arith.constant 0 : index
    %c0_10 = arith.constant 0 : index
    %10 = vector.load %arg5[%c0_9, %c0_10] : memref<1x6xf32, #tpu.memory_space<vmem>>, vector<1x6xf32>
    %11 = vector.broadcast %10 : vector<1x6xf32> to vector<8x6xf32>
    %12 = arith.addf %9, %11 : vector<8x6xf32>
    %c0_11 = arith.constant 0 : index
    %c0_12 = arith.constant 0 : index
    %13 = vector.load %arg6[%c0_11, %c0_12] : memref<8x3xi32, #tpu.memory_space<vmem>>, vector<8x3xi32>
    %14 = vector.extract_strided_slice %12 {offsets = [0, 0], sizes = [8, 3], strides = [1, 1]} : vector<8x6xf32> to vector<8x3xf32>
    %15 = vector.extract_strided_slice %12 {offsets = [0, 3], sizes = [8, 3], strides = [1, 1]} : vector<8x6xf32> to vector<8x3xf32>
    %c0_i32 = arith.constant 0 : i32
    %16 = vector.broadcast %c0_i32 : i32 to vector<8x3xi32>
    %17 = arith.cmpf ogt, %15, %14 : vector<8x3xf32>
    %c1_i32 = arith.constant 1 : i32
    %18 = vector.broadcast %c1_i32 : i32 to vector<8x3xi32>
    %19 = arith.select %17, %18, %16 : vector<8x3xi1>, vector<8x3xi32>
    %20 = arith.maximumf %14, %15 : vector<8x3xf32>
    %c0_13 = arith.constant 0 : index
    %c0_14 = arith.constant 0 : index
    %21 = vector.load %arg8[%c0_13, %c0_14] : memref<8x3xi32, #tpu.memory_space<vmem>>, vector<8x3xi32>
    tpu.vector_store %arg8[%c0_13, %c0_14], %19 {strides = array<i32>} : memref<8x3xi32, #tpu.memory_space<vmem>>, vector<8x3xi32>,
    %cst_15 = arith.constant 0.000000e+00 : f32
    %22 = vector.broadcast %cst_15 : f32 to vector<8x3xf32>
    %cst_16 = arith.constant 0.000000e+00 : f32
    %23 = vector.broadcast %cst_16 : f32 to vector<8x3xf32>
    %24 = arith.subf %14, %20 : vector<8x3xf32>
    %25 = math.exp %24 : vector<8x3xf32>
    %26 = arith.addf %22, %25 : vector<8x3xf32>
    %c0_i32_17 = arith.constant 0 : i32
    %27 = vector.broadcast %c0_i32_17 : i32 to vector<8x3xi32>
    %28 = arith.cmpi eq, %13, %27 : vector<8x3xi32>
    %cst_18 = arith.constant 0.000000e+00 : f32
    %29 = vector.broadcast %cst_18 : f32 to vector<8x3xf32>
    %30 = arith.select %28, %14, %29 : vector<8x3xi1>, vector<8x3xf32>
    %31 = arith.addf %23, %30 : vector<8x3xf32>
    %32 = arith.subf %15, %20 : vector<8x3xf32>
    %33 = math.exp %32 : vector<8x3xf32>
    %34 = arith.addf %26, %33 : vector<8x3xf32>
    %c1_i32_19 = arith.constant 1 : i32
    %35 = vector.broadcast %c1_i32_19 : i32 to vector<8x3xi32>
    %36 = arith.cmpi eq, %13, %35 : vector<8x3xi32>
    %cst_20 = arith.constant 0.000000e+00 : f32
    %37 = vector.broadcast %cst_20 : f32 to vector<8x3xf32>
    %38 = arith.select %36, %15, %37 : vector<8x3xi1>, vector<8x3xf32>
    %39 = arith.addf %31, %38 : vector<8x3xf32>
    %40 = math.log %34 : vector<8x3xf32>
    %41 = arith.addf %20, %40 : vector<8x3xf32>
    %42 = arith.subf %41, %39 : vector<8x3xf32>
    %43 = vector.shape_cast %42 : vector<8x3xf32> to vector<1x8x3xf32>
    %cst_21 = arith.constant dense<0.000000e+00> : vector<1xf32>
    %44 = vector.multi_reduction <add>, %43, %cst_21 [1, 2] : vector<1x8x3xf32> to vector<1xf32>
    %45 = vector.shape_cast %44 : vector<1xf32> to vector<1x1x1xf32>
    %46 = vector.extract %45[0, 0, 0] : f32 from vector<1x1x1xf32>
    %cst_22 = arith.constant 1.250000e-01 : f32
    %47 = arith.mulf %46, %cst_22 : f32
    %c0_23 = arith.constant 0 : index
    %c0_24 = arith.constant 0 : index
    %48 = memref.load %arg7[%c0_23, %c0_24] : memref<1x1xf32, #tpu.memory_space<smem>>
    memref.store %47, %arg7[%c0_23, %c0_24] : memref<1x1xf32, #tpu.memory_space<smem>>
    return
  }
  func.func @transform_0(%arg0: i32) -> (i32, i32) {
    %c0_i32 = arith.constant 0 : i32
    %c0_i32_0 = arith.constant 0 : i32
    %c0_i32_1 = arith.constant 0 : i32
    return %c0_i32, %c0_i32_0 : i32, i32
  }
  func.func @transform_1(%arg0: i32) -> (i32, i32) {
    %c0_i32 = arith.constant 0 : i32
    %c0_i32_0 = arith.constant 0 : i32
    %c0_i32_1 = arith.constant 0 : i32
    return %c0_i32, %c0_i32_0 : i32, i32
  }
  func.func @transform_2(%arg0: i32) -> (i32, i32) {
    %c0_i32 = arith.constant 0 : i32
    %c0_i32_0 = arith.constant 0 : i32
    %c0_i32_1 = arith.constant 0 : i32
    return %c0_i32, %c0_i32_0 : i32, i32
  }
  func.func @transform_3(%arg0: i32) -> (i32, i32) {
    %c0_i32 = arith.constant 0 : i32
    %c0_i32_0 = arith.constant 0 : i32
    %c0_i32_1 = arith.constant 0 : i32
    return %c0_i32, %c0_i32_0 : i32, i32
  }
  func.func @transform_4(%arg0: i32) -> (i32, i32) {
    %c0_i32 = arith.constant 0 : i32
    %c0_i32_0 = arith.constant 0 : i32
    %c0_i32_1 = arith.constant 0 : i32
    return %c0_i32, %c0_i32_0 : i32, i32
  }
  func.func @transform_5(%arg0: i32) -> (i32, i32) {
    %c0_i32 = arith.constant 0 : i32
    %c0_i32_0 = arith.constant 0 : i32
    %c0_i32_1 = arith.constant 0 : i32
    return %c0_i32, %c0_i32_0 : i32, i32
  }
  func.func @transform_6(%arg0: i32) -> (i32, i32) {
    %c0_i32 = arith.constant 0 : i32
    %c0_i32_0 = arith.constant 0 : i32
    %c0_i32_1 = arith.constant 0 : i32
    return %c0_i32, %c0_i32_0 : i32, i32
  }
  func.func @transform_7(%arg0: i32) -> (i32, i32) {
    %c0_i32 = arith.constant 0 : i32
    %c0_i32_0 = arith.constant 0 : i32
    %c0_i32_1 = arith.constant 0 : i32
    return %c0_i32, %c0_i32_0 : i32, i32
  }
}

</mosaic_0001>

<bundles_post_ra>
// kernel: attackers_forward.1
= control target key start
LH: loop header
LB: loop body
LE: loop exit
PB: predicated region body
PF: predicated region fallthrough
CT: control target
= control target key end

     0   :  { %vm41_vm0 = vcmask 261120   ;;  %s422_s0 = inlined_call_operand.vmem [shape: f32[8,32], index: 0, kind: input, shape index: {}]   ;;  %s423_s1 = inlined_call_operand.vmem [shape: f32[32,192], index: 1, kind: input, shape index: {}]   ;;  %s424_s2 = inlined_call_operand.vmem [shape: f32[1,192], index: 2, kind: input, shape index: {}]   ;;  %s425_s3 = inlined_call_operand.vmem [shape: f32[192,6], index: 3, kind: input, shape index: {}]   ;;  %s426_s4 = inlined_call_operand.vmem [shape: f32[1,6], index: 4, kind: input, shape index: {}]   ;;  %s427_s5 = inlined_call_operand.vmem [shape: s32[8,3], index: 5, kind: input, shape index: {}]   ;;  %s428_s6 = inlined_call_operand.hbm [shape: f32[1,1], index: 6, kind: output, shape index: {0}]   ;;  %s429_s7 = inlined_call_operand.vmem [shape: s32[8,3], index: 7, kind: output, shape index: {1}]  }
   0x1   :  { %v33_v0 = vld [vmem:[%s423_s1 + $0x30] sm:$0xff]  ;;  %v31_v1 = vld [vmem:[%s423_s1 + $0x20] sm:$0xff]  ;;  %v34_v2 = vld [vmem:[%s423_s1 + $0x38] sm:$0xff] }
   0x2   :  { %57 = vmatpush.msra.mxu0 %v33_v0  ;;  %77 = vmatpush.msra.mxu1 %v34_v2  ;;  %v32_v3 = vld [vmem:[%s423_s1 + $0x28] sm:$0xff]  ;;  %v29_v4 = vld [vmem:[%s423_s1 + $0x10] sm:$0xff]  ;;  %v30_v5 = vld [vmem:[%s423_s1 + $0x18] sm:$0xff] }
   0x3   :  { %v102_v6 = vld [vmem:[%s425_s3 + $0x78] sm:$0xff]  ;;  %v101_v7 = vld [vmem:[%s425_s3 + $0x70] sm:$0xff]  ;;  %v27_v8 = vld [vmem:[%s423_s1] sm:$0xff] }
   0x4   :  { %58 = vmatpush.msra.mxu0 %v31_v1  ;;  %78 = vmatpush.msra.mxu1 %v32_v3  ;;  %v28_v9 = vld [vmem:[%s423_s1 + $0x8] sm:$0xff]  ;;  %v26_v10 = vld [vmem:[%s422_s0] sm:$0xff]  ;;  %v110_v12 = vld [vmem:[%s425_s3 + $0xb8] sm:$0xff] }
   0x5   :  { %119 = vmatpush.msra.mxu2 %v102_v6  ;;  %v100_v11 = vld [vmem:[%s425_s3 + $0x68] sm:$0xff]  ;;  %v99_v13 = vld [vmem:[%s425_s3 + $0x60] sm:$0xff]  ;;  %v109_v14 = vld [vmem:[%s425_s3 + $0xb0] sm:$0xff]  ;;  %147 = vmatpush.msra.mxu3 %v110_v12 }
   0x6   :  { %59 = vmatpush.msra.mxu0 %v29_v4  ;;  %79 = vmatpush.msra.mxu1 %v30_v5 }
   0x7   :  { %120 = vmatpush.msra.mxu2 %v101_v7 }
   0x8   :  { %60 = vmatpush.msra.mxu0 %v27_v8  ;;  %80 = vmatpush.msra.mxu1 %v28_v9 }
   0x9   :  { %232 = vmatmul.msk.f32.vlgmr.msra.gmra.mxu0 %vm41_vm0, %v26_v10  ;;  %233 = vmatmul.msk.f32.vlgmr.msra.gmra.mxu1 %vm41_vm0, %v26_v10 }
   0xa   :  { %121 = vmatpush.msra.mxu2 %v100_v11 }
   0xb   :  { %13 = vsyncpa [#allocation3], 0  ;;  %v98_v15 = vld [vmem:[%s425_s3 + $0x58] sm:$0xff]  ;;  %v108_v16 = vld [vmem:[%s425_s3 + $0xa8] sm:$0xff]  ;;  %148 = vmatpush.msra.mxu3 %v109_v14  ;;  %vm115_vm1 = vcmask 523264   ;;  %v264_v48 = vmov 0  }
   0xc   :  { %122 = vmatpush.msra.mxu2 %v99_v13  ;;  %v97_v17 = vld [vmem:[%s425_s3 + $0x50] sm:$0xff]  ;;  %v107_v18 = vld [vmem:[%s425_s3 + $0xa0] sm:$0xff]  ;;  %v96_v19 = vld [vmem:[%s425_s3 + $0x48] sm:$0xff]  ;;  %vm172_vm3 = vcmask 23552   ;;  %s218_s24 = sshll.u32 %s428_s6, 4  ;;  %s265_s1 = smov [#allocation2]   ;;  %s219_s24 = int_to_ptr.hbm [resolvable:$true] %s218_s24 }
   0xd   :  { %149 = vmatpush.msra.mxu3 %v108_v16  ;;  %v95_v20 = vld [vmem:[%s425_s3 + $0x40] sm:$0xff]  ;;  %v94_v21 = vld [vmem:[%s425_s3 + $0x38] sm:$0xff]  ;;  %v93_v22 = vld [vmem:[%s425_s3 + $0x30] sm:$0xff] }
   0xe   :  { %123 = vmatpush.msra.mxu2 %v98_v15  ;;  %v92_v23 = vld [vmem:[%s425_s3 + $0x28] sm:$0xff]  ;;  %v91_v24 = vld [vmem:[%s425_s3 + $0x20] sm:$0xff]  ;;  %v90_v25 = vld [vmem:[%s425_s3 + $0x18] sm:$0xff] }
   0xf   :  { %150 = vmatpush.msra.mxu3 %v107_v18  ;;  %v89_v26 = vld [vmem:[%s425_s3 + $0x10] sm:$0xff]  ;;  %v106_v27 = vld [vmem:[%s425_s3 + $0x98] sm:$0xff]  ;;  %v88_v28 = vld [vmem:[%s425_s3 + $0x8] sm:$0xff] }
  0x10   :  { %124 = vmatpush.msra.mxu2 %v97_v17  ;;  %v105_v29 = vld [vmem:[%s425_s3 + $0x90] sm:$0xff]  ;;  %v87_v30 = vld [vmem:[%s425_s3] sm:$0xff]  ;;  %v104_v31 = vld [vmem:[%s425_s3 + $0x88] sm:$0xff] }
  0x11   :  { %151 = vmatpush.msra.mxu3 %v106_v27  ;;  %v103_v32 = vld [vmem:[%s425_s3 + $0x80] sm:$0xff]  ;;  %s263_s3 = smov 125  }
  0x12   :  { %125 = vmatpush.msra.mxu2 %v96_v19  ;;  %v35_v33 = vld [vmem:[%s424_s2] sm:$0x3]  ;;  %s262_s2 = smov 3  }
  0x13   :  { %152 = vmatpush.msra.mxu3 %v105_v29  ;;  %v37_v34 = vperm.slane %v35_v33, 0  ;;  %v38_v35 = vperm.slane %v35_v33, 1  ;;  %v241_v42 = vld [vmem:[%s426_s4] ss:$0 sm:$0xff] }
  0x14   :  { %126 = vmatpush.msra.mxu2 %v95_v20  ;;  %v159_v62 = vld [vmem:[%s427_s5] sm:$0xff] }
  0x15   :  { %153 = vmatpush.msra.mxu3 %v104_v31  ;;  %vm193_vm4 = vcmp.eq.s32.totalorder %v159_v62, 1  ;;  %vm178_vm5 = vcmp.eq.s32.totalorder %v159_v62, 0 }
  0x16   :  { %127 = vmatpush.msra.mxu2 %v94_v21 }
  0x17   :  { %154 = vmatpush.msra.mxu3 %v103_v32 }
  0x18   :  { %128 = vmatpush.msra.mxu2 %v93_v22 }
  0x1a   :  { %129 = vmatpush.msra.mxu2 %v92_v23 }
  0x1c   :  { %130 = vmatpush.msra.mxu2 %v91_v24 }
  0x1e   :  { %131 = vmatpush.msra.mxu2 %v90_v25 }
  0x20   :  { %132 = vmatpush.msra.mxu2 %v89_v26 }
  0x22   :  { %133 = vmatpush.msra.mxu2 %v88_v28 }
  0x24   :  { %134 = vmatpush.msra.mxu2 %v87_v30 }
  0x86   :  { %v62_v36 = vpop.f32.mrf.mxu0  ;;  %v82_v37 = vpop.f32.mrf.mxu1 }
  0x87   :  { %v63_v38 = vadd.f32 %v62_v36, %v37_v34  ;;  %v83_v39 = vadd.f32 %v82_v37, %v38_v35 }
  0x89   :  { %v85_v40 = vmax.f32 %v63_v38, 0.0  ;;  %v86_v41 = vmax.f32 %v83_v39, 0.0 }
  0x8b   :  { %135 = vmatmul.f32.vlgmr.msra.gmra.mxu2 %v85_v40  ;;  %234 = vmatmul.msk.f32.vlgmr.msra.gmra.mxu3 %vm115_vm1, %v86_v41 }
 0x10e   :  { %v136_v43 = vpop.f32.mrf.mxu2  ;;  %v156_v44 = vpop.f32.mrf.mxu3 }
 0x10f   :  { %v137_v45 = vadd.f32 %v241_v42, %v136_v43 }
 0x111   :  { %v157_v46 = vadd.f32 %v156_v44, %v137_v45 }
 0x113   :  { %161 = vrot.lane.b32.xlu2 %v157_v46, %s262_s2  ;;  %166 = vrot.lane.b32.xlu0 %v157_v46, %s263_s3  ;;  %v179_v2 = vsel %vm178_vm5, %v157_v46, 0.0 }
 0x16d   :  { %v162_v47 = vpop.permute.xlu2 %161 }
 0x16e   :  { %vm164_vm2 = vcmp.gt.f32.partialorder %v157_v46, %v162_v47 }
 0x16f   :  { %v165_v49 = vsel %vm164_vm2, 1, %v264_v48 }
 0x170   :  { %170 = vrot.lane.b32.xlu2 %v165_v49, %s263_s3 }
 0x185   :  { %v167_v50 = vpop.permute.xlu0 %166 }
 0x186   :  { %v169_v51 = vmax.f32 %v157_v46, %v167_v50  ;;  %v194_v0 = vsel %vm193_vm4, %v167_v50, 0.0 }
 0x187   :  { %v195_v3 = vadd.f32 %v194_v0, %v179_v2 }
 0x188   :  { %182 = vrot.lane.b32.xlu0 %v169_v51, %s262_s2  ;;  %v174_v57 = vsub.f32 %v157_v46, %v169_v51 }
 0x18a   :  { %v175_v58 = vmul.f32 1.442695, %v174_v57 }
 0x1ca   :  { %v171_v52 = vpop.permute.xlu2 %170 }
 0x1cb   :  { %173 = vst.msk [vmem:[%s429_s7] sm:$0xff] %vm172_vm3, %v171_v52 }
 0x1fa   :  { %v183_v53 = vpop.permute.xlu0 %182 }
 0x1fb   :  { %v185_v54 = vsub.f32 %v157_v46, %v183_v53 }
 0x1fd   :  { %v186_v55 = vmul.f32 1.442695, %v185_v54 }
 0x1ff   :  { %242 = vpow2.f32 %v186_v55 }
 0x200   :  { %244 = vpow2.f32 %v175_v58 }
 0x205   :  { %v243_v56 = vpop.eup %242 }
 0x206   :  { %189 = vrot.lane.b32.xlu1 %v243_v56, %s263_s3  ;;  %v245_v59 = vpop.eup %244 }
 0x278   :  { %v190_v60 = vpop.permute.xlu1 %189 }
 0x279   :  { %v192_v61 = vadd.f32 %v245_v59, %v190_v60 }
 0x27b   :  { %246 = vlog2.f32 %v192_v61 }
 0x281   :  { %v247_v63 = vpop.eup %246 }
 0x282   :  { %v197_v1 = vmul.f32 0.6931472, %v247_v63 }
 0x284   :  { %v198_v4 = vadd.f32 %v197_v1, %v169_v51 }
 0x286   :  { %v199_v5 = vsub.f32 %v198_v4, %v195_v3 }
 0x288   :  { %v200_v6 = vsel %vm172_vm3, %v199_v5, 0.0 }
 0x289   :  { %201 = vadd.xlane.f32.xlu1 %v200_v6 }
 0x2fc   :  { %v202_v7 = vpop.xlane.xlu1 %201 }
 0x2fd   :  { %v203_v8 = vrot.slane %v202_v7, 4 }
 0x2ff   :  { %v204_v9 = vadd.f32 %v203_v8, %v202_v7 }
 0x301   :  { %v205_v10 = vrot.slane %v204_v9, 2 }
 0x303   :  { %v206_v11 = vadd.f32 %v205_v10, %v204_v9 }
 0x305   :  { %v207_v12 = vrot.slane %v206_v11, 1 }
 0x307   :  { %v208_v13 = vadd.f32 %v207_v12, %v206_v11 }
 0x309   :  { %235 = vpush %v208_v13 }
 0x33a   :  { %s236_s25 = spop %235 }
 0x33b   :  { %s210_s26 = smul.f32 0.125, %s236_s25 }
 0x33d   :  { %212 = sst [smem:[#allocation2]] %s210_s26 }
 0x33e   :  { %221 = dma.smem_to_hbm %s265_s1, 16, %s219_s24, [#allocation3]  }
 0x33f   :  { %260 = dma.done.wait [#allocation3], 16  }
 0x340   :  { %261 = vsyncadd [#allocation3], 4294967280 }
 0x341   :  { %230 = sfence }
 0x342   :  { %231 = vsyncpa [#allocation3], 1 }

</bundles_post_ra>
